<compile_context>
chip_gen: v7x
topology: tpu7x:2x2x1
jax: 0.10.0
libtpu: 0.0.40
codegen_flags: <defaults>
</compile_context>

<pallas_src>
import functools

import jax
import jax.numpy as jnp
import numpy as np
from jax.experimental import pallas as pl
from jax.experimental.pallas import tpu as pltpu

EPS = 1e-5


# ----------------------------------------------------------------------------
# Kernel
# ----------------------------------------------------------------------------
def _conv_bn_relu(x2, bw_ref, p, s_mat, top, bot, inv_count):
    """Fused conv3x3 (single K-stacked matmul) + training-mode BN + ReLU.

    x2:     (M, WC) f32 lane-dense activation (M = N*H, WC = W*C)
    bw_ref: VMEM ref (3*WC, WC) banded weights, rows stacked along K per ky
    p:      (2, WC) f32 = [gamma, beta], each channel-tiled across W
    s_mat:  (WC, WC) channel-indicator matrix (folds W-groups & re-broadcasts)
    top/bot:(M, 1) bool masks for first / last row of each image (H boundary)
    """
    M, WC = x2.shape

    # --- conv: build [x(h-1) | x(h) | x(h+1)] with XLU rolls, one matmul -----
    x_dn = jnp.where(top, 0.0, pltpu.roll(x2, 1, 0))        # row h-1 (ky=0)
    x_up = jnp.where(bot, 0.0, pltpu.roll(x2, M - 1, 0))    # row h+1 (ky=2)
    lhs = jnp.concatenate([x_dn, x2, x_up], axis=1)         # (M, 3*WC)
    acc = jnp.dot(lhs, bw_ref[...],
                  preferred_element_type=jnp.float32)       # (M, WC)
    # (conv bias intentionally omitted: cancelled by the BN mean subtraction)

    # --- BatchNorm (biased batch stats over N,H,W), single pass --------------
    # NOTE: E[x^2]-E[x]^2 is cancellation-prone at large means; fine at this
    # scale/tolerance, switch to two-pass when scaling up.
    s1 = jnp.sum(acc, axis=0, keepdims=True)                # per-(w,c) sums
    s2 = jnp.sum(acc * acc, axis=0, keepdims=True)
    stats = jnp.dot(jnp.concatenate([s1, s2], axis=0), s_mat,
                    preferred_element_type=jnp.float32)     # per-channel, tiled
    mean = stats[0:1] * inv_count
    var = stats[1:2] * inv_count - mean * mean
    scale = p[0:1] * jax.lax.rsqrt(var + EPS)               # gamma * rsqrt (EUP)
    shift = p[1:2] - mean * scale                           # folded affine
    return jnp.maximum(acc * scale + shift, 0.0)            # (M, WC)


def basic_block_kernel(x_ref, bw1_ref, p1_ref, bw2_ref, p2_ref, s_ref, out_ref,
                       *, H, inv_count):
    M, WC = x_ref.shape
    x2 = x_ref[...]                                         # (M, WC)
    s_mat = s_ref[...]                                      # (WC, WC)

    # Batch-image boundary masks, computed once and shared by both convs.
    row = jax.lax.broadcasted_iota(jnp.int32, (M, 1), 0)
    top = (row % H) == 0
    bot = (row % H) == (H - 1)

    y = _conv_bn_relu(x2, bw1_ref, p1_ref[...], s_mat, top, bot, inv_count)
    z = _conv_bn_relu(y, bw2_ref, p2_ref[...], s_mat, top, bot, inv_count)

    # residual add + final ReLU, lane-dense store (full 128-lane vst)
    out_ref[...] = jnp.maximum(z + x2, 0.0)


# ----------------------------------------------------------------------------
# One-time parameter preparation (jnp ops only -> jit/trace friendly)
# ----------------------------------------------------------------------------
def _banded_stacked(w_hwio, W):
    """(3,3,Ci,Co) HWIO conv weights -> (3*W*Ci, W*Co) K-stacked banded matrix.

    Block [wi, wo] of row-group ky equals w[ky, kx] with kx = wi - wo + 1;
    built as sum_kx kron(shift_matrix(1-kx), w[ky, kx]).
    """
    w = jnp.asarray(w_hwio, jnp.float32)
    mats = []
    for ky in range(3):
        b = sum(jnp.kron(jnp.eye(W, k=1 - kx, dtype=jnp.float32), w[ky, kx])
                for kx in range(3))
        mats.append(b)
    return jnp.concatenate(mats, axis=0)                    # (3*W*Ci, W*Co)


def _channel_sum(W, C):
    """(W*C, W*C) with S[i,j] = 1 if i%C == j%C: sums W-groups & re-broadcasts."""
    idx = jnp.arange(W * C, dtype=jnp.int32) % C
    return (idx[:, None] == idx[None, :]).astype(jnp.float32)


def prepare_basic_block(params, W):
    """Run once per weight set; the conv biases are unused (cancelled by BN)."""
    w1, _b1, g1, be1, w2, _b2, g2, be2 = params
    BW1 = _banded_stacked(w1, W)                            # (3*WC, WC)
    BW2 = _banded_stacked(w2, W)
    p1 = jnp.stack([jnp.tile(g1, W), jnp.tile(be1, W)])     # (2, WC)
    p2 = jnp.stack([jnp.tile(g2, W), jnp.tile(be2, W)])
    S = _channel_sum(W, w1.shape[2])                        # (WC, WC)
    return BW1, p1, BW2, p2, S


# ----------------------------------------------------------------------------
# Jitted forward wrapper
# ----------------------------------------------------------------------------
@jax.jit
def basic_block_forward(x_nchw, BW1, p1, BW2, p2, S):
    """x_nchw: (N, C, H, W) float32. Returns (N, C, H, W)."""
    N, C, H, W = x_nchw.shape
    WC = W * C

    # lane-dense view: (N*H, W*C) with W*C == 128
    x_ld = jnp.transpose(x_nchw, (0, 2, 3, 1)).reshape(N * H, WC)

    kernel = functools.partial(basic_block_kernel, H=H,
                               inv_count=1.0 / float(N * H * W))

    out = pl.pallas_call(
        kernel,
        out_shape=jax.ShapeDtypeStruct((N * H, WC), jnp.float32),
        in_specs=[pl.BlockSpec(memory_space=pltpu.MemorySpace.VMEM)] * 6,
        out_specs=pl.BlockSpec(memory_space=pltpu.MemorySpace.VMEM),
    )(x_ld, BW1, p1, BW2, p2, S)

    return jnp.transpose(out.reshape(N, H, W, C), (0, 3, 1, 2))  # back to NCHW


# ----------------------------------------------------------------------------
# Pure-JAX reference (matches the PyTorch forward, training-mode BN, bias=True)
# ----------------------------------------------------------------------------
def basic_block_reference(x_nchw, params):
    w1, b1, g1, be1, w2, b2, g2, be2 = params

    def conv(x, w, b):
        y = jax.lax.conv_general_dilated(
            x, w, window_strides=(1, 1), padding=((1, 1), (1, 1)),
            dimension_numbers=("NCHW", "HWIO", "NCHW"))
        return y + b.reshape(1, -1, 1, 1)

    def bn(x, g, be):
        mean = jnp.mean(x, axis=(0, 2, 3), keepdims=True)
        var = jnp.mean((x - mean) ** 2, axis=(0, 2, 3), keepdims=True)
        return ((x - mean) * (g.reshape(1, -1, 1, 1) * jax.lax.rsqrt(var + EPS))
                + be.reshape(1, -1, 1, 1))

    out = jnp.maximum(bn(conv(x_nchw, w1, b1), g1, be1), 0.0)
    out = jnp.maximum(bn(conv(out, w2, b2), g2, be2), 0.0)
    return jnp.maximum(out + x_nchw, 0.0)


if __name__ == "__main__":
    N, C, H, W = 2, 8, 16, 16        # inplanes == planes, stride=1, downsample=None

    key = jax.random.PRNGKey(0)
    k_x, k_w1, k_b1, k_w2, k_b2 = jax.random.split(key, 5)

    x = jax.random.normal(k_x, (N, C, H, W), jnp.float32)

    # Synthetic parameters (shapes match nn.Conv2d(HWIO) / nn.BatchNorm2d defaults).
    w1 = 0.1 * jax.random.normal(k_w1, (3, 3, C, C), jnp.float32)
    b1 = 0.1 * jax.random.normal(k_b1, (C,), jnp.float32)
    w2 = 0.1 * jax.random.normal(k_w2, (3, 3, C, C), jnp.float32)
    b2 = 0.1 * jax.random.normal(k_b2, (C,), jnp.float32)
    g1 = jnp.ones((C,), jnp.float32)
    be1 = jnp.zeros((C,), jnp.float32)
    g2 = jnp.ones((C,), jnp.float32)
    be2 = jnp.zeros((C,), jnp.float32)
    params = (w1, b1, g1, be1, w2, b2, g2, be2)

    # One-time prep (outside the per-call path), then a single jitted forward.
    prep = prepare_basic_block(params, W)
    out = jax.block_until_ready(basic_block_forward(x, *prep))
    ref = jax.block_until_ready(basic_block_reference(x, params))

    np.testing.assert_allclose(np.asarray(out), np.asarray(ref),
                               rtol=1e-4, atol=2e-4)
    print("KERNEL_OK")
</pallas_src>

<mosaic_0001>
module attributes {stable_mosaic.version = 11 : i64} {
  func.func @basic_block_kernel(%arg0: memref<32x128xf32, #tpu.memory_space<vmem>>, %arg1: memref<384x128xf32, #tpu.memory_space<vmem>>, %arg2: memref<2x128xf32, #tpu.memory_space<vmem>>, %arg3: memref<384x128xf32, #tpu.memory_space<vmem>>, %arg4: memref<2x128xf32, #tpu.memory_space<vmem>>, %arg5: memref<128x128xf32, #tpu.memory_space<vmem>>, %arg6: memref<32x128xf32, #tpu.memory_space<vmem>>) attributes {dimension_semantics = [], scalar_prefetch = 0 : i64, scratch_operands = 0 : i64, tpu.core_type = #tpu.core_type<tc>} {
    %c0 = arith.constant 0 : index
    %c0_0 = arith.constant 0 : index
    %0 = vector.load %arg0[%c0, %c0_0] : memref<32x128xf32, #tpu.memory_space<vmem>>, vector<32x128xf32>
    %c0_1 = arith.constant 0 : index
    %c0_2 = arith.constant 0 : index
    %1 = vector.load %arg5[%c0_1, %c0_2] : memref<128x128xf32, #tpu.memory_space<vmem>>, vector<128x128xf32>
    %2 = tpu.iota {dimensions = array<i32: 0>} : vector<32x1xi32>
    %c16_i32 = arith.constant 16 : i32
    %c0_i32 = arith.constant 0 : i32
    %3 = arith.cmpi eq, %c16_i32, %c0_i32 : i32
    %c1_i32 = arith.constant 1 : i32
    %4 = arith.select %3, %c1_i32, %c16_i32 : i32
    %5 = vector.broadcast %4 : i32 to vector<32x1xi32>
    %6 = arith.remsi %2, %5 : vector<32x1xi32>
    %c0_i32_3 = arith.constant 0 : i32
    %7 = vector.broadcast %c0_i32_3 : i32 to vector<32x1xi32>
    %8 = arith.cmpi ne, %6, %7 : vector<32x1xi32>
    %c0_i32_4 = arith.constant 0 : i32
    %9 = vector.broadcast %c0_i32_4 : i32 to vector<32x1xi32>
    %10 = arith.cmpi slt, %6, %9 : vector<32x1xi32>
    %c0_i32_5 = arith.constant 0 : i32
    %11 = arith.cmpi slt, %4, %c0_i32_5 : i32
    %12 = vector.broadcast %11 : i1 to vector<32x1xi1>
    %13 = vector.broadcast %12 : vector<32x1xi1> to vector<32x1xi1>
    %14 = arith.xori %10, %13 : vector<32x1xi1>
    %15 = arith.andi %14, %8 : vector<32x1xi1>
    %16 = vector.broadcast %4 : i32 to vector<32x1xi32>
    %17 = arith.addi %6, %16 : vector<32x1xi32>
    %18 = arith.select %15, %17, %6 : vector<32x1xi1>, vector<32x1xi32>
    %c0_i32_6 = arith.constant 0 : i32
    %19 = vector.broadcast %c0_i32_6 : i32 to vector<32x1xi32>
    %20 = arith.cmpi eq, %18, %19 : vector<32x1xi32>
    %c16_i32_7 = arith.constant 16 : i32
    %c0_i32_8 = arith.constant 0 : i32
    %21 = arith.cmpi eq, %c16_i32_7, %c0_i32_8 : i32
    %c1_i32_9 = arith.constant 1 : i32
    %22 = arith.select %21, %c1_i32_9, %c16_i32_7 : i32
    %23 = vector.broadcast %22 : i32 to vector<32x1xi32>
    %24 = arith.remsi %2, %23 : vector<32x1xi32>
    %c0_i32_10 = arith.constant 0 : i32
    %25 = vector.broadcast %c0_i32_10 : i32 to vector<32x1xi32>
    %26 = arith.cmpi ne, %24, %25 : vector<32x1xi32>
    %c0_i32_11 = arith.constant 0 : i32
    %27 = vector.broadcast %c0_i32_11 : i32 to vector<32x1xi32>
    %28 = arith.cmpi slt, %24, %27 : vector<32x1xi32>
    %c0_i32_12 = arith.constant 0 : i32
    %29 = arith.cmpi slt, %22, %c0_i32_12 : i32
    %30 = vector.broadcast %29 : i1 to vector<32x1xi1>
    %31 = vector.broadcast %30 : vector<32x1xi1> to vector<32x1xi1>
    %32 = arith.xori %28, %31 : vector<32x1xi1>
    %33 = arith.andi %32, %26 : vector<32x1xi1>
    %34 = vector.broadcast %22 : i32 to vector<32x1xi32>
    %35 = arith.addi %24, %34 : vector<32x1xi32>
    %36 = arith.select %33, %35, %24 : vector<32x1xi1>, vector<32x1xi32>
    %c15_i32 = arith.constant 15 : i32
    %37 = vector.broadcast %c15_i32 : i32 to vector<32x1xi32>
    %38 = arith.cmpi eq, %36, %37 : vector<32x1xi32>
    %c0_13 = arith.constant 0 : index
    %c0_14 = arith.constant 0 : index
    %39 = vector.load %arg2[%c0_13, %c0_14] : memref<2x128xf32, #tpu.memory_space<vmem>>, vector<2x128xf32>
    %c1_i32_15 = arith.constant 1 : i32
    %40 = tpu.dynamic_rotate %0 by %c1_i32_15 dim 0 : vector<32x128xf32>, i32 -> vector<32x128xf32>
    %cst = arith.constant 0.000000e+00 : f32
    %41 = vector.shape_cast %20 : vector<32x1xi1> to vector<32x1xi1>
    %42 = vector.broadcast %41 : vector<32x1xi1> to vector<32x128xi1>
    %43 = vector.broadcast %cst : f32 to vector<32x128xf32>
    %44 = arith.select %42, %43, %40 : vector<32x128xi1>, vector<32x128xf32>
    %c31_i32 = arith.constant 31 : i32
    %45 = tpu.dynamic_rotate %0 by %c31_i32 dim 0 : vector<32x128xf32>, i32 -> vector<32x128xf32>
    %cst_16 = arith.constant 0.000000e+00 : f32
    %46 = vector.shape_cast %38 : vector<32x1xi1> to vector<32x1xi1>
    %47 = vector.broadcast %46 : vector<32x1xi1> to vector<32x128xi1>
    %48 = vector.broadcast %cst_16 : f32 to vector<32x128xf32>
    %49 = arith.select %47, %48, %45 : vector<32x128xi1>, vector<32x128xf32>
    %50 = tpu.concatenate %44, %0, %49 in 1 : vector<32x128xf32>, vector<32x128xf32>, vector<32x128xf32> -> vector<32x384xf32>
    %c0_17 = arith.constant 0 : index
    %c0_18 = arith.constant 0 : index
    %51 = vector.load %arg1[%c0_17, %c0_18] : memref<384x128xf32, #tpu.memory_space<vmem>>, vector<384x128xf32>
    %cst_19 = arith.constant dense<0.000000e+00> : vector<32x128xf32>
    %52 = tpu.matmul %50, %51, %cst_19 {dimension_numbers = #tpu.dot_dimension_numbers<[1], [0], [0], [1], [0, 0, 1, 1], [], []>} : vector<32x384xf32>, vector<384x128xf32>, vector<32x128xf32> -> vector<32x128xf32>
    %cst_20 = arith.constant dense<0.000000e+00> : vector<128xf32>
    %53 = vector.multi_reduction <add>, %52, %cst_20 [0] : vector<32x128xf32> to vector<128xf32>
    %54 = vector.shape_cast %53 : vector<128xf32> to vector<1x128xf32>
    %55 = arith.mulf %52, %52 : vector<32x128xf32>
    %cst_21 = arith.constant dense<0.000000e+00> : vector<128xf32>
    %56 = vector.multi_reduction <add>, %55, %cst_21 [0] : vector<32x128xf32> to vector<128xf32>
    %57 = vector.shape_cast %56 : vector<128xf32> to vector<1x128xf32>
    %58 = tpu.concatenate %54, %57 in 0 : vector<1x128xf32>, vector<1x128xf32> -> vector<2x128xf32>
    %cst_22 = arith.constant dense<0.000000e+00> : vector<2x128xf32>
    %59 = tpu.matmul %58, %1, %cst_22 {dimension_numbers = #tpu.dot_dimension_numbers<[1], [0], [0], [1], [0, 0, 1, 1], [], []>} : vector<2x128xf32>, vector<128x128xf32>, vector<2x128xf32> -> vector<2x128xf32>
    %60 = vector.extract_strided_slice %59 {offsets = [0, 0], sizes = [1, 128], strides = [1, 1]} : vector<2x128xf32> to vector<1x128xf32>
    %cst_23 = arith.constant 0.001953125 : f32
    %61 = vector.broadcast %cst_23 : f32 to vector<1x128xf32>
    %62 = arith.mulf %60, %61 : vector<1x128xf32>
    %63 = vector.extract_strided_slice %59 {offsets = [1, 0], sizes = [1, 128], strides = [1, 1]} : vector<2x128xf32> to vector<1x128xf32>
    %cst_24 = arith.constant 0.001953125 : f32
    %64 = vector.broadcast %cst_24 : f32 to vector<1x128xf32>
    %65 = arith.mulf %63, %64 : vector<1x128xf32>
    %66 = arith.mulf %62, %62 : vector<1x128xf32>
    %67 = arith.subf %65, %66 : vector<1x128xf32>
    %68 = vector.extract_strided_slice %39 {offsets = [0, 0], sizes = [1, 128], strides = [1, 1]} : vector<2x128xf32> to vector<1x128xf32>
    %cst_25 = arith.constant 9.99999974E-6 : f32
    %69 = vector.broadcast %cst_25 : f32 to vector<1x128xf32>
    %70 = arith.addf %67, %69 : vector<1x128xf32>
    %71 = math.rsqrt %70 : vector<1x128xf32>
    %72 = arith.mulf %68, %71 : vector<1x128xf32>
    %73 = vector.extract_strided_slice %39 {offsets = [1, 0], sizes = [1, 128], strides = [1, 1]} : vector<2x128xf32> to vector<1x128xf32>
    %74 = arith.mulf %62, %72 : vector<1x128xf32>
    %75 = arith.subf %73, %74 : vector<1x128xf32>
    %76 = vector.broadcast %72 : vector<1x128xf32> to vector<32x128xf32>
    %77 = arith.mulf %52, %76 : vector<32x128xf32>
    %78 = vector.broadcast %75 : vector<1x128xf32> to vector<32x128xf32>
    %79 = arith.addf %77, %78 : vector<32x128xf32>
    %cst_26 = arith.constant 0.000000e+00 : f32
    %80 = vector.broadcast %cst_26 : f32 to vector<32x128xf32>
    %81 = arith.maximumf %79, %80 : vector<32x128xf32>
    %c0_27 = arith.constant 0 : index
    %c0_28 = arith.constant 0 : index
    %82 = vector.load %arg4[%c0_27, %c0_28] : memref<2x128xf32, #tpu.memory_space<vmem>>, vector<2x128xf32>
    %c1_i32_29 = arith.constant 1 : i32
    %83 = tpu.dynamic_rotate %81 by %c1_i32_29 dim 0 : vector<32x128xf32>, i32 -> vector<32x128xf32>
    %cst_30 = arith.constant 0.000000e+00 : f32
    %84 = vector.shape_cast %20 : vector<32x1xi1> to vector<32x1xi1>
    %85 = vector.broadcast %84 : vector<32x1xi1> to vector<32x128xi1>
    %86 = vector.broadcast %cst_30 : f32 to vector<32x128xf32>
    %87 = arith.select %85, %86, %83 : vector<32x128xi1>, vector<32x128xf32>
    %c31_i32_31 = arith.constant 31 : i32
    %88 = tpu.dynamic_rotate %81 by %c31_i32_31 dim 0 : vector<32x128xf32>, i32 -> vector<32x128xf32>
    %cst_32 = arith.constant 0.000000e+00 : f32
    %89 = vector.shape_cast %38 : vector<32x1xi1> to vector<32x1xi1>
    %90 = vector.broadcast %89 : vector<32x1xi1> to vector<32x128xi1>
    %91 = vector.broadcast %cst_32 : f32 to vector<32x128xf32>
    %92 = arith.select %90, %91, %88 : vector<32x128xi1>, vector<32x128xf32>
    %93 = tpu.concatenate %87, %81, %92 in 1 : vector<32x128xf32>, vector<32x128xf32>, vector<32x128xf32> -> vector<32x384xf32>
    %c0_33 = arith.constant 0 : index
    %c0_34 = arith.constant 0 : index
    %94 = vector.load %arg3[%c0_33, %c0_34] : memref<384x128xf32, #tpu.memory_space<vmem>>, vector<384x128xf32>
    %cst_35 = arith.constant dense<0.000000e+00> : vector<32x128xf32>
    %95 = tpu.matmul %93, %94, %cst_35 {dimension_numbers = #tpu.dot_dimension_numbers<[1], [0], [0], [1], [0, 0, 1, 1], [], []>} : vector<32x384xf32>, vector<384x128xf32>, vector<32x128xf32> -> vector<32x128xf32>
    %cst_36 = arith.constant dense<0.000000e+00> : vector<128xf32>
    %96 = vector.multi_reduction <add>, %95, %cst_36 [0] : vector<32x128xf32> to vector<128xf32>
    %97 = vector.shape_cast %96 : vector<128xf32> to vector<1x128xf32>
    %98 = arith.mulf %95, %95 : vector<32x128xf32>
    %cst_37 = arith.constant dense<0.000000e+00> : vector<128xf32>
    %99 = vector.multi_reduction <add>, %98, %cst_37 [0] : vector<32x128xf32> to vector<128xf32>
    %100 = vector.shape_cast %99 : vector<128xf32> to vector<1x128xf32>
    %101 = tpu.concatenate %97, %100 in 0 : vector<1x128xf32>, vector<1x128xf32> -> vector<2x128xf32>
    %cst_38 = arith.constant dense<0.000000e+00> : vector<2x128xf32>
    %102 = tpu.matmul %101, %1, %cst_38 {dimension_numbers = #tpu.dot_dimension_numbers<[1], [0], [0], [1], [0, 0, 1, 1], [], []>} : vector<2x128xf32>, vector<128x128xf32>, vector<2x128xf32> -> vector<2x128xf32>
    %103 = vector.extract_strided_slice %102 {offsets = [0, 0], sizes = [1, 128], strides = [1, 1]} : vector<2x128xf32> to vector<1x128xf32>
    %cst_39 = arith.constant 0.001953125 : f32
    %104 = vector.broadcast %cst_39 : f32 to vector<1x128xf32>
    %105 = arith.mulf %103, %104 : vector<1x128xf32>
    %106 = vector.extract_strided_slice %102 {offsets = [1, 0], sizes = [1, 128], strides = [1, 1]} : vector<2x128xf32> to vector<1x128xf32>
    %cst_40 = arith.constant 0.001953125 : f32
    %107 = vector.broadcast %cst_40 : f32 to vector<1x128xf32>
    %108 = arith.mulf %106, %107 : vector<1x128xf32>
    %109 = arith.mulf %105, %105 : vector<1x128xf32>
    %110 = arith.subf %108, %109 : vector<1x128xf32>
    %111 = vector.extract_strided_slice %82 {offsets = [0, 0], sizes = [1, 128], strides = [1, 1]} : vector<2x128xf32> to vector<1x128xf32>
    %cst_41 = arith.constant 9.99999974E-6 : f32
    %112 = vector.broadcast %cst_41 : f32 to vector<1x128xf32>
    %113 = arith.addf %110, %112 : vector<1x128xf32>
    %114 = math.rsqrt %113 : vector<1x128xf32>
    %115 = arith.mulf %111, %114 : vector<1x128xf32>
    %116 = vector.extract_strided_slice %82 {offsets = [1, 0], sizes = [1, 128], strides = [1, 1]} : vector<2x128xf32> to vector<1x128xf32>
    %117 = arith.mulf %105, %115 : vector<1x128xf32>
    %118 = arith.subf %116, %117 : vector<1x128xf32>
    %119 = vector.broadcast %115 : vector<1x128xf32> to vector<32x128xf32>
    %120 = arith.mulf %95, %119 : vector<32x128xf32>
    %121 = vector.broadcast %118 : vector<1x128xf32> to vector<32x128xf32>
    %122 = arith.addf %120, %121 : vector<32x128xf32>
    %cst_42 = arith.constant 0.000000e+00 : f32
    %123 = vector.broadcast %cst_42 : f32 to vector<32x128xf32>
    %124 = arith.maximumf %122, %123 : vector<32x128xf32>
    %125 = arith.addf %124, %0 : vector<32x128xf32>
    %cst_43 = arith.constant 0.000000e+00 : f32
    %126 = vector.broadcast %cst_43 : f32 to vector<32x128xf32>
    %127 = arith.maximumf %125, %126 : vector<32x128xf32>
    %c0_44 = arith.constant 0 : index
    %c0_45 = arith.constant 0 : index
    %128 = vector.load %arg6[%c0_44, %c0_45] : memref<32x128xf32, #tpu.memory_space<vmem>>, vector<32x128xf32>
    tpu.vector_store %arg6[%c0_44, %c0_45], %127 {strides = array<i32>} : memref<32x128xf32, #tpu.memory_space<vmem>>, vector<32x128xf32>,
    return
  }
}

</mosaic_0001>

<bundles_post_ra>
// kernel: basic_block_forward.1
= control target key start
LH: loop header
LB: loop body
LE: loop exit
PB: predicated region body
PF: predicated region fallthrough
CT: control target
= control target key end

     0   :  { %v43_v39 = vlaneseq  ;;  %vm1397_vm6 = vmmov 0   ;;  %vm387_vm7 = vcmask 1040384   ;;  %s1988_s1 = inlined_call_operand.vmem [shape: f32[384,128], index: 1, kind: input, shape index: {}]   ;;  %s1989_s0 = inlined_call_operand.vmem [shape: f32[32,128], index: 0, kind: input, shape index: {}]   ;;  %s1990_s5 = inlined_call_operand.vmem [shape: f32[128,128], index: 5, kind: input, shape index: {}]   ;;  %s1991_s3 = inlined_call_operand.vmem [shape: f32[384,128], index: 3, kind: input, shape index: {}]   ;;  %s1992_s2 = inlined_call_operand.vmem [shape: f32[2,128], index: 2, kind: input, shape index: {}]   ;;  %s1993_s4 = inlined_call_operand.vmem [shape: f32[2,128], index: 4, kind: input, shape index: {}]   ;;  %s1994_s6 = inlined_call_operand.vmem [shape: f32[32,128], index: 6, kind: output, shape index: {}]  }
   0x1   :  { %v163_v0 = vld [vmem:[%s1988_s1 + $0x80] sm:$0xff]  ;;  %v164_v1 = vld [vmem:[%s1988_s1 + $0x88] sm:$0xff]  ;;  %v165_v9 = vld [vmem:[%s1988_s1 + $0x90] sm:$0xff] }
   0x2   :  { %v147_v2 = vld [vmem:[%s1988_s1] sm:$0xff]  ;;  %v1213_v3 = vpack.c.bf16 %v164_v1, %v163_v0  ;;  %v148_v4 = vld [vmem:[%s1988_s1 + $0x8] sm:$0xff]  ;;  %v166_v10 = vld [vmem:[%s1988_s1 + $0x98] sm:$0xff]  ;;  %v1536_v49 = vshrl.u32 %v43_v39, 7 }
   0x3   :  { %v179_v5 = vld [vmem:[%s1988_s1 + $0x100] sm:$0xff]  ;;  %v180_v6 = vld [vmem:[%s1988_s1 + $0x108] sm:$0xff]  ;;  %v1215_v7 = vpack.c.bf16 %v148_v4, %v147_v2  ;;  %v149_v11 = vld [vmem:[%s1988_s1 + $0x10] sm:$0xff]  ;;  %v1217_v12 = vpack.c.bf16 %v166_v10, %v165_v9 }
   0x4   :  { %v1245_v8 = vpack.c.bf16 %v180_v6, %v179_v5  ;;  %1214 = vmatprep.subr.bf16.mxu0 %v1213_v3  ;;  %v150_v13 = vld [vmem:[%s1988_s1 + $0x18] sm:$0xff]  ;;  %v181_v14 = vld [vmem:[%s1988_s1 + $0x110] sm:$0xff]  ;;  %v167_v18 = vld [vmem:[%s1988_s1 + $0xa0] sm:$0xff]  ;;  %vm130_vm0 = vcmp.lt.s32.totalorder %v1536_v49, 7  ;;  %vm109_vm1 = vcmp.lt.s32.totalorder %v1536_v49, 1 }
   0x5   :  { %v182_v15 = vld [vmem:[%s1988_s1 + $0x118] sm:$0xff]  ;;  %1216 = vmatpush3.bf16.msra.mxu0 %v1215_v7  ;;  %v1219_v16 = vpack.c.bf16 %v150_v13, %v149_v11  ;;  %v168_v19 = vld [vmem:[%s1988_s1 + $0xa8] sm:$0xff]  ;;  %v151_v20 = vld [vmem:[%s1988_s1 + $0x20] sm:$0xff] }
   0x6   :  { %1246 = vmatprep.subr.bf16.mxu1 %v1245_v8  ;;  %v1249_v17 = vpack.c.bf16 %v182_v15, %v181_v14  ;;  %1218 = vmatprep.subr.bf16.mxu0 %v1217_v12  ;;  %v1221_v21 = vpack.c.bf16 %v168_v19, %v167_v18  ;;  %v152_v22 = vld [vmem:[%s1988_s1 + $0x28] sm:$0xff]  ;;  %v183_v23 = vld [vmem:[%s1988_s1 + $0x120] sm:$0xff]  ;;  %v169_v26 = vld [vmem:[%s1988_s1 + $0xb0] sm:$0xff]  ;;  %v45_v14 = vadd.s32 8, %v1536_v49  ;;  %v52_v19 = vand.u32 15, %v1536_v49 }
   0x7   :  { %1248 = vmatpush3.bf16.msra.mxu1 %v1245_v8  ;;  %v184_v24 = vld [vmem:[%s1988_s1 + $0x128] sm:$0xff]  ;;  %v170_v27 = vld [vmem:[%s1988_s1 + $0xb8] sm:$0xff]  ;;  %v185_v28 = vld [vmem:[%s1988_s1 + $0x130] sm:$0xff]  ;;  %v1223_v30 = vpack.c.bf16 %v152_v22, %v151_v20 }
   0x8   :  { %1250 = vmatprep.subr.bf16.mxu1 %v1249_v17  ;;  %v1253_v25 = vpack.c.bf16 %v184_v24, %v183_v23  ;;  %v186_v29 = vld [vmem:[%s1988_s1 + $0x138] sm:$0xff]  ;;  %v1225_v31 = vpack.c.bf16 %v170_v27, %v169_v26  ;;  %v153_v32 = vld [vmem:[%s1988_s1 + $0x30] sm:$0xff]  ;;  %v171_v35 = vld [vmem:[%s1988_s1 + $0xc0] sm:$0xff]  ;;  %v47_v23 = vadd.s32 24, %v1536_v49  ;;  %vm1618_vm2 = vcmp.ne.s32.totalorder %v52_v19, 0 }
   0x9   :  { %1220 = vmatpush3.bf16.msra.mxu0 %v1219_v16  ;;  %v154_v33 = vld [vmem:[%s1988_s1 + $0x38] sm:$0xff]  ;;  %v1257_v34 = vpack.c.bf16 %v186_v29, %v185_v28  ;;  %v172_v36 = vld [vmem:[%s1988_s1 + $0xc8] sm:$0xff]  ;;  %v187_v37 = vld [vmem:[%s1988_s1 + $0x140] sm:$0xff]  ;;  %v46_v28 = vadd.s32 16, %v1536_v49 }
   0xa   :  { %1222 = vmatprep.subr.bf16.mxu0 %v1221_v21  ;;  %v188_v38 = vld [vmem:[%s1988_s1 + $0x148] sm:$0xff]  ;;  %v1227_v40 = vpack.c.bf16 %v154_v33, %v153_v32  ;;  %v1229_v41 = vpack.c.bf16 %v172_v36, %v171_v35  ;;  %v155_v42 = vld [vmem:[%s1988_s1 + $0x40] sm:$0xff]  ;;  %v173_v45 = vld [vmem:[%s1988_s1 + $0xd0] sm:$0xff]  ;;  %v59_v21 = vand.u32 15, %v45_v14 }
   0xb   :  { %1252 = vmatpush3.bf16.msra.mxu1 %v1249_v17  ;;  %v156_v43 = vld [vmem:[%s1988_s1 + $0x48] sm:$0xff]  ;;  %v1261_v44 = vpack.c.bf16 %v188_v38, %v187_v37  ;;  %v174_v46 = vld [vmem:[%s1988_s1 + $0xd8] sm:$0xff]  ;;  %v189_v47 = vld [vmem:[%s1988_s1 + $0x150] sm:$0xff] }
   0xc   :  { %1254 = vmatprep.subr.bf16.mxu1 %v1253_v25  ;;  %v190_v48 = vld [vmem:[%s1988_s1 + $0x158] sm:$0xff]  ;;  %v1231_v50 = vpack.c.bf16 %v156_v43, %v155_v42  ;;  %v1541_v51 = vld [vmem:[%s1989_s0] sm:$0xff]  ;;  %v1233_v52 = vpack.c.bf16 %v174_v46, %v173_v45  ;;  %v157_v53 = vld [vmem:[%s1988_s1 + $0x50] sm:$0xff]  ;;  %vm1626_vm3 = vcmp.ne.s32.totalorder %v59_v21, 15 }
   0xd   :  { %1224 = vmatpush3.bf16.msra.mxu0 %v1223_v30  ;;  %v158_v54 = vld [vmem:[%s1988_s1 + $0x58] sm:$0xff]  ;;  %v1552_v55 = vld [vmem:[%s1989_s0 + $0x8] sm:$0xff]  ;;  %v126_v56 = vrot.slane %v1541_v51, 1  ;;  %v1265_v57 = vpack.c.bf16 %v190_v48, %v189_v47  ;;  %v175_v58 = vld [vmem:[%s1988_s1 + $0xe0] sm:$0xff]  ;;  %259 = vmatprep.mubr.f32.mxu0 %v1541_v51  ;;  %v105_v18 = vrot.slane %v1541_v51, 7 }
   0xe   :  { %1226 = vmatprep.subr.bf16.mxu0 %v1225_v31  ;;  %v176_v59 = vld [vmem:[%s1988_s1 + $0xe8] sm:$0xff]  ;;  %v127_v60 = vrot.slane %v1552_v55, 1  ;;  %v191_v61 = vld [vmem:[%s1988_s1 + $0x160] sm:$0xff]  ;;  %v1235_v63 = vpack.c.bf16 %v158_v54, %v157_v53  ;;  %v177_v5 = vld [vmem:[%s1988_s1 + $0xf0] sm:$0xff]  ;;  %v106_v27 = vrot.slane %v1552_v55, 7  ;;  %v73_v31 = vand.u32 15, %v47_v23 }
   0xf   :  { %1256 = vmatpush3.bf16.msra.mxu1 %v1253_v25  ;;  %v192_v62 = vld [vmem:[%s1988_s1 + $0x168] sm:$0xff]  ;;  %v1237_v1 = vpack.c.bf16 %v176_v59, %v175_v58  ;;  %v159_v2 = vld [vmem:[%s1988_s1 + $0x60] sm:$0xff]  ;;  %v178_v6 = vld [vmem:[%s1988_s1 + $0xf8] sm:$0xff] }
  0x10   :  { %1258 = vmatprep.subr.bf16.mxu1 %v1257_v34  ;;  %v133_v0 = vsel %vm130_vm0, %v126_v56, %v127_v60  ;;  %v160_v3 = vld [vmem:[%s1988_s1 + $0x68] sm:$0xff]  ;;  %v1269_v4 = vpack.c.bf16 %v192_v62, %v191_v61  ;;  %v193_v7 = vld [vmem:[%s1988_s1 + $0x170] sm:$0xff]  ;;  %v194_v8 = vld [vmem:[%s1988_s1 + $0x178] sm:$0xff]  ;;  %v1241_v10 = vpack.c.bf16 %v178_v6, %v177_v5  ;;  %v112_v33 = vsel %vm109_vm1, %v105_v18, %v106_v27 }
  0x11   :  { %1228 = vmatpush3.bf16.msra.mxu0 %v1227_v40  ;;  %1099 = vmatprep.mubr.f32.mxu1 %v133_v0  ;;  %v1239_v9 = vpack.c.bf16 %v160_v3, %v159_v2  ;;  %v161_v11 = vld [vmem:[%s1988_s1 + $0x70] sm:$0xff]  ;;  %v162_v12 = vld [vmem:[%s1988_s1 + $0x78] sm:$0xff]  ;;  %v1273_v15 = vpack.c.bf16 %v194_v8, %v193_v7  ;;  %vm1644_vm4 = vcmp.ne.s32.totalorder %v73_v31, 15  ;;  %v28_v42 = vld [vmem:[%s1990_s5 + $0x8] sm:$0xff] }
  0x12   :  { %1230 = vmatprep.subr.bf16.mxu0 %v1229_v41  ;;  %v1601_v13 = vld [vmem:[%s1989_s0 + $0x18] sm:$0xff]  ;;  %v1607_v16 = vld [vmem:[%s1989_s0 + $0x10] sm:$0xff]  ;;  %v1243_v17 = vpack.c.bf16 %v162_v12, %v161_v11  ;;  %v27_v41 = vld [vmem:[%s1990_s5] sm:$0xff] }
  0x13   :  { %1260 = vmatpush3.bf16.msra.mxu1 %v1257_v34  ;;  %v108_v20 = vrot.slane %v1601_v13, 7  ;;  %v128_v22 = vrot.slane %v1607_v16, 1  ;;  %v129_v24 = vrot.slane %v1601_v13, 1  ;;  %v66_v34 = vand.u32 15, %v46_v28  ;;  %v29_v45 = vld [vmem:[%s1990_s5 + $0x10] sm:$0xff]  ;;  %v30_v46 = vld [vmem:[%s1990_s5 + $0x18] sm:$0xff] }
  0x14   :  { %1262 = vmatprep.subr.bf16.mxu1 %v1261_v44  ;;  %v107_v35 = vrot.slane %v1607_v16, 7  ;;  %v1668_v43 = vpack.c.bf16 %v28_v42, %v27_v41  ;;  %v1679_v47 = vpack.c.bf16 %v30_v46, %v29_v45  ;;  %v31_v48 = vld [vmem:[%s1990_s5 + $0x20] sm:$0xff]  ;;  %v33_v53 = vld [vmem:[%s1990_s5 + $0x30] sm:$0xff]  ;;  %v34_v54 = vld [vmem:[%s1990_s5 + $0x38] sm:$0xff] }
  0x15   :  { %1232 = vmatpush3.bf16.msra.mxu0 %v1231_v50  ;;  %v113_v25 = vsel %vm109_vm1, %v108_v20, %v105_v18  ;;  %v132_v29 = vsel %vm130_vm0, %v127_v60, %v128_v22  ;;  %v131_v32 = vsel %vm130_vm0, %v128_v22, %v129_v24  ;;  %v134_v36 = vsel %vm130_vm0, %v129_v24, %v126_v56  ;;  %v32_v50 = vld [vmem:[%s1990_s5 + $0x28] sm:$0xff]  ;;  %v37_v60 = vld [vmem:[%s1990_s5 + $0x50] sm:$0xff]  ;;  %v38_v61 = vld [vmem:[%s1990_s5 + $0x58] sm:$0xff] }
  0x16   :  { %1234 = vmatprep.subr.bf16.mxu0 %v1233_v52  ;;  %v111_v38 = vsel %vm109_vm1, %v106_v27, %v107_v35  ;;  %vm1651_vm5 = vcmp.ne.s32.totalorder %v66_v34, 0  ;;  %v110_v40 = vsel %vm109_vm1, %v107_v35, %v108_v20  ;;  %v1689_v52 = vpack.c.bf16 %v32_v50, %v31_v48  ;;  %v36_v58 = vld [vmem:[%s1990_s5 + $0x48] sm:$0xff]  ;;  %v41_v2 = vld [vmem:[%s1990_s5 + $0x70] sm:$0xff]  ;;  %v42_v3 = vld [vmem:[%s1990_s5 + $0x78] sm:$0xff] }
  0x17   :  { %1264 = vmatpush3.bf16.msra.mxu1 %v1261_v44  ;;  %v1396_v44 = vmov 0.0|0.0   ;;  %v1699_v56 = vpack.c.bf16 %v34_v54, %v33_v53  ;;  %v1719_v62 = vpack.c.bf16 %v38_v61, %v37_v60  ;;  %v40_v0 = vld [vmem:[%s1990_s5 + $0x68] sm:$0xff]  ;;  %v1740_v5 = vpack.c.bf16 %v42_v3, %v41_v2  ;;  %v537_v2 = vld [vmem:[%s1991_s3 + $0x80] sm:$0xff] }
  0x18   :  { %1266 = vmatprep.subr.bf16.mxu1 %v1265_v57  ;;  %v538_v3 = vld [vmem:[%s1991_s3 + $0x88] sm:$0xff] }
  0x19   :  { %1236 = vmatpush3.bf16.msra.mxu0 %v1235_v63  ;;  %v39_v63 = vld [vmem:[%s1990_s5 + $0x60] sm:$0xff] }
  0x1a   :  { %1238 = vmatprep.subr.bf16.mxu0 %v1237_v1  ;;  %v1729_v1 = vpack.c.bf16 %v40_v0, %v39_v63 }
  0x1b   :  { %1268 = vmatpush3.bf16.msra.mxu1 %v1265_v57  ;;  %v35_v57 = vld [vmem:[%s1990_s5 + $0x40] sm:$0xff] }
  0x1c   :  { %1270 = vmatprep.subr.bf16.mxu1 %v1269_v4  ;;  %v1709_v59 = vpack.c.bf16 %v36_v58, %v35_v57 }
  0x1d   :  { %1240 = vmatpush3.bf16.msra.mxu0 %v1239_v9 }
  0x1e   :  { %1242 = vmatprep.subr.bf16.mxu0 %v1241_v10 }
  0x1f   :  { %1272 = vmatpush3.bf16.msra.mxu1 %v1269_v4  ;;  %v1398_v4 = vmov 0.0  }
  0x20   :  { %1274 = vmatprep.subr.bf16.mxu1 %v1273_v15 }
  0x21   :  { %1244 = vmatpush3.bf16.msra.mxu0 %v1243_v17 }
  0x22   :  { %1277 = vmatprep.subr.bf16.mxu0 %v1396_v44 }
  0x23   :  { %1276 = vmatpush3.bf16.msra.mxu1 %v1273_v15 }
  0x24   :  { %886 = vmatmul.mubr.msk.f32.vlgmr.msra.gmra.mrb[0].mxu0 %vm1618_vm2, %v113_v25 }
  0x25   :  { %264 = vmatprep.mubr.f32.mxu0 %v1552_v55  ;;  %1279 = vmatpush3.bf16.msra.mxu0 %v1668_v43 }
  0x26   :  { %1100 = vmatmul.mubr.msk.f32.vlgmr.msra.gmra.mrb[0].mxu1 %vm1626_vm3, %v132_v29  ;;  %1280 = vmatprep.subr.bf16.mxu0 %v1396_v44 }
  0x27   :  { %1102 = vmatprep.mubr.f32.mxu1 %v131_v32 }
  0x28   :  { %265 = vmatmul.mubr.f32.gmra.mrb[2].mxu0 %v112_v33 }
  0x29   :  { %269 = vmatprep.mubr.f32.mxu0 %v1607_v16  ;;  %1282 = vmatpush3.bf16.msra.mxu0 %v1679_v47 }
  0x2a   :  { %1103 = vmatmul.mubr.msk.f32.gmra.mrb[2].mxu1 %vm1644_vm4, %v134_v36  ;;  %1283 = vmatprep.subr.bf16.mxu0 %v1396_v44 }
  0x2c   :  { %888 = vmatmul.mubr.msk.f32.gmra.mrb[4].mxu0 %vm1651_vm5, %v111_v38 }
  0x2d   :  { %274 = vmatprep.mubr.f32.mxu0 %v1601_v13  ;;  %1285 = vmatpush3.bf16.msra.mxu0 %v1689_v52 }
  0x2e   :  { %1286 = vmatprep.subr.bf16.mxu0 %v1396_v44 }
  0x30   :  { %275 = vmatmul.mubr.f32.gmra.mrb[6].mxu0 %v110_v40 }
  0x31   :  { %1288 = vmatpush3.bf16.msra.mxu0 %v1699_v56  ;;  %1137 = vmatprep.mubr.msk.f32.mxu0 %vm1397_vm6, %v1398_v4 }
  0x32   :  { %1289 = vmatprep.subr.bf16.mxu0 %v1396_v44 }
  0x35   :  { %1291 = vmatpush3.bf16.msra.mxu0 %v1709_v59 }
  0x36   :  { %1292 = vmatprep.subr.bf16.mxu0 %v1396_v44 }
  0x39   :  { %1294 = vmatpush3.bf16.msra.mxu0 %v1719_v62 }
  0x3a   :  { %1295 = vmatprep.subr.bf16.mxu0 %v1396_v44 }
  0x3d   :  { %1297 = vmatpush3.bf16.msra.mxu0 %v1729_v1 }
  0x3e   :  { %1298 = vmatprep.subr.bf16.mxu0 %v1396_v44 }
  0x41   :  { %1300 = vmatpush3.bf16.msra.mxu0 %v1740_v5 }
  0xf7   :  { %v937_v6 = vpop.f32.mrb[0].mxu0 }
  0xf8   :  { %v938_v7 = vpop.f32.mrb[1].mxu0 }
  0xf9   :  { %v1101_v8 = vpop.f32.mrb[0].mxu1  ;;  %v939_v9 = vadd.f32 %v938_v7, %v937_v6  ;;  %v1301_v6 = vpack.c.bf16 %v538_v3, %v537_v2  ;;  %v521_v7 = vld [vmem:[%s1991_s3] sm:$0xff] }
  0xfa   :  { %v346_v10 = vpop.f32.mrb[1].mxu1  ;;  %v561_v2 = vld [vmem:[%s1991_s3 + $0x140] sm:$0xff] }
  0xfb   :  { %v1744_v11 = vadd.f32 %v939_v9, %v346_v10  ;;  %v940_v12 = vpop.f32.mrb[2].mxu0  ;;  %v553_v9 = vld [vmem:[%s1991_s3 + $0x100] sm:$0xff]  ;;  %1302 = vmatprep.subr.bf16.mxu1 %v1301_v6  ;;  %v562_v6 = vld [vmem:[%s1991_s3 + $0x148] sm:$0xff] }
  0xfc   :  { %v941_v14 = vpop.f32.mrb[3].mxu0 }
  0xfd   :  { %v1104_v15 = vpop.f32.mrb[2].mxu1  ;;  %v942_v17 = vadd.f32 %v941_v14, %v940_v12  ;;  %v374_v28 = vmul.f32 %v1744_v11, %v1744_v11  ;;  %v554_v12 = vld [vmem:[%s1991_s3 + $0x108] sm:$0xff] }
  0xfe   :  { %v356_v18 = vpop.f32.mrb[3].mxu1  ;;  %v1333_v14 = vpack.c.bf16 %v554_v12, %v553_v9  ;;  %v548_v9 = vld [vmem:[%s1991_s3 + $0xd8] sm:$0xff]  ;;  %v531_v12 = vld [vmem:[%s1991_s3 + $0x50] sm:$0xff] }
  0xff   :  { %v1746_v19 = vadd.f32 %v1101_v8, %v942_v17  ;;  %v943_v20 = vpop.f32.mrb[4].mxu0  ;;  %v522_v8 = vld [vmem:[%s1991_s3 + $0x8] sm:$0xff]  ;;  %v540_v17 = vld [vmem:[%s1991_s3 + $0x98] sm:$0xff] }
 0x100   :  { %v944_v21 = vpop.f32.mrb[5].mxu0  ;;  %v1303_v10 = vpack.c.bf16 %v522_v8, %v521_v7  ;;  %1334 = vmatprep.subr.bf16.mxu0 %v1333_v14  ;;  %v1349_v7 = vpack.c.bf16 %v562_v6, %v561_v2  ;;  %v547_v8 = vld [vmem:[%s1991_s3 + $0xd0] sm:$0xff]  ;;  %v478_v2 = vsub.s32 0, %v1536_v49 }
 0x101   :  { %v945_v22 = vadd.f32 %v944_v21, %v943_v20  ;;  %v375_v23 = vmul.f32 %v1746_v19, %v1746_v19  ;;  %v365_v29 = vadd.f32 %v1746_v19, %v1744_v11  ;;  %v523_v20 = vld [vmem:[%s1991_s3 + $0x10] sm:$0xff]  ;;  %v524_v21 = vld [vmem:[%s1991_s3 + $0x18] sm:$0xff] }
 0x102   :  { %1304 = vmatpush3.bf16.msra.mxu1 %v1303_v10  ;;  %v1321_v10 = vpack.c.bf16 %v548_v9, %v547_v8  ;;  %v486_v9 = vsub.s32 1, %v1536_v49 }
 0x103   :  { %v1750_v24 = vadd.f32 %v945_v22, %v356_v18  ;;  %v946_v25 = vpop.f32.mrb[6].mxu0  ;;  %v378_v34 = vadd.f32 %v375_v23, %v374_v28  ;;  %v555_v22 = vld [vmem:[%s1991_s3 + $0x110] sm:$0xff]  ;;  %v1307_v23 = vpack.c.bf16 %v524_v21, %v523_v20  ;;  %v541_v28 = vld [vmem:[%s1991_s3 + $0xa0] sm:$0xff] }
 0x104   :  { %v947_v27 = vpop.f32.mrb[7].mxu0  ;;  %v549_v21 = vld [vmem:[%s1991_s3 + $0xe0] sm:$0xff] }
 0x105   :  { %v376_v31 = vmul.f32 %v1750_v24, %v1750_v24  ;;  %v948_v32 = vadd.f32 %v947_v27, %v946_v25  ;;  %v366_v33 = vadd.f32 %v365_v29, %v1750_v24  ;;  %v556_v25 = vld [vmem:[%s1991_s3 + $0x118] sm:$0xff]  ;;  %v542_v29 = vld [vmem:[%s1991_s3 + $0xa8] sm:$0xff] }
 0x106   :  { %v1337_v27 = vpack.c.bf16 %v556_v25, %v555_v22  ;;  %v550_v22 = vld [vmem:[%s1991_s3 + $0xe8] sm:$0xff]  ;;  %v533_v25 = vld [vmem:[%s1991_s3 + $0x60] sm:$0xff] }
 0x107   :  { %v1759_v35 = vadd.f32 %v1104_v15, %v948_v32  ;;  %v379_v36 = vadd.f32 %v378_v34, %v376_v31  ;;  %v539_v15 = vld [vmem:[%s1991_s3 + $0x90] sm:$0xff]  ;;  %v1309_v31 = vpack.c.bf16 %v542_v29, %v541_v28  ;;  %v525_v32 = vld [vmem:[%s1991_s3 + $0x20] sm:$0xff] }
 0x108   :  { %v1305_v18 = vpack.c.bf16 %v540_v17, %v539_v15  ;;  %v557_v34 = vld [vmem:[%s1991_s3 + $0x120] sm:$0xff]  ;;  %v563_v15 = vld [vmem:[%s1991_s3 + $0x150] sm:$0xff] }
 0x109   :  { %v367_v38 = vadd.f32 %v366_v33, %v1759_v35  ;;  %v377_v40 = vmul.f32 %v1759_v35, %v1759_v35  ;;  %v526_v33 = vld [vmem:[%s1991_s3 + $0x28] sm:$0xff]  ;;  %v565_v28 = vld [vmem:[%s1991_s3 + $0x160] sm:$0xff] }
 0x10a   :  { %1306 = vmatprep.subr.bf16.mxu1 %v1305_v18  ;;  %v564_v18 = vld [vmem:[%s1991_s3 + $0x158] sm:$0xff] }
 0x10b   :  { %v368_v41 = vrot.slane %v367_v38, 4  ;;  %v380_v42 = vadd.f32 %v379_v36, %v377_v40  ;;  %1308 = vmatpush3.bf16.msra.mxu1 %v1307_v23  ;;  %v1311_v36 = vpack.c.bf16 %v526_v33, %v525_v32  ;;  %v1353_v20 = vpack.c.bf16 %v564_v18, %v563_v15  ;;  %v551_v33 = vld [vmem:[%s1991_s3 + $0xf0] sm:$0xff] }
 0x10c   :  { %1310 = vmatprep.subr.bf16.mxu1 %v1309_v31  ;;  %v1325_v23 = vpack.c.bf16 %v550_v22, %v549_v21  ;;  %v566_v31 = vld [vmem:[%s1991_s3 + $0x168] sm:$0xff] }
 0x10d   :  { %v369_v45 = vadd.f32 %v368_v41, %v367_v38  ;;  %v381_v46 = vrot.slane %v380_v42, 4  ;;  %v558_v38 = vld [vmem:[%s1991_s3 + $0x128] sm:$0xff]  ;;  %v543_v41 = vld [vmem:[%s1991_s3 + $0xb0] sm:$0xff]  ;;  %v1357_v32 = vpack.c.bf16 %v566_v31, %v565_v28 }
 0x10e   :  { %v1341_v40 = vpack.c.bf16 %v558_v38, %v557_v34  ;;  %v552_v34 = vld [vmem:[%s1991_s3 + $0xf8] sm:$0xff] }
 0x10f   :  { %v370_v48 = vrot.slane %v369_v45, 2  ;;  %v382_v50 = vadd.f32 %v381_v46, %v380_v42  ;;  %1312 = vmatpush3.bf16.msra.mxu1 %v1311_v36  ;;  %v544_v42 = vld [vmem:[%s1991_s3 + $0xb8] sm:$0xff]  ;;  %v527_v46 = vld [vmem:[%s1991_s3 + $0x30] sm:$0xff]  ;;  %v1329_v38 = vpack.c.bf16 %v552_v34, %v551_v33 }
 0x110   :  { %v535_v36 = vld [vmem:[%s1991_s3 + $0x70] sm:$0xff] }
 0x111   :  { %v371_v53 = vadd.f32 %v370_v48, %v369_v45  ;;  %v383_v54 = vrot.slane %v382_v50, 2  ;;  %v1313_v45 = vpack.c.bf16 %v544_v42, %v543_v41  ;;  %v528_v48 = vld [vmem:[%s1991_s3 + $0x38] sm:$0xff]  ;;  %v567_v41 = vld [vmem:[%s1991_s3 + $0x170] sm:$0xff] }
 0x112   :  { %v568_v42 = vld [vmem:[%s1991_s3 + $0x178] sm:$0xff] }
 0x113   :  { %v372_v57 = vrot.slane %v371_v53, 1  ;;  %v384_v58 = vadd.f32 %v383_v54, %v382_v50  ;;  %v559_v50 = vld [vmem:[%s1991_s3 + $0x130] sm:$0xff]  ;;  %v560_v54 = vld [vmem:[%s1991_s3 + $0x138] sm:$0xff]  ;;  %1314 = vmatprep.subr.bf16.mxu1 %v1313_v45 }
 0x115   :  { %v385_v60 = vrot.slane %v384_v58, 1  ;;  %v373_v61 = vadd.f32 %v372_v57, %v371_v53  ;;  %v1315_v53 = vpack.c.bf16 %v528_v48, %v527_v46  ;;  %v1345_v57 = vpack.c.bf16 %v560_v54, %v559_v50 }
 0x116   :  { %v1361_v46 = vpack.c.bf16 %v568_v42, %v567_v41 }
 0x117   :  { %v386_v63 = vadd.f32 %v385_v60, %v384_v58  ;;  %1316 = vmatpush3.bf16.msra.mxu1 %v1315_v53  ;;  %v545_v58 = vld [vmem:[%s1991_s3 + $0xc0] sm:$0xff]  ;;  %v546_v60 = vld [vmem:[%s1991_s3 + $0xc8] sm:$0xff] }
 0x119   :  { %v388_v0 = vsel %vm387_vm7, %v373_v61, %v386_v63  ;;  %v1317_v61 = vpack.c.bf16 %v546_v60, %v545_v58  ;;  %v529_v63 = vld [vmem:[%s1991_s3 + $0x40] sm:$0xff] }
 0x11a   :  { %1138 = vmatmul.mubr.f32.vlgmr.msra.gmra.mrb[8].mxu0 %v388_v0  ;;  %v530_v0 = vld [vmem:[%s1991_s3 + $0x48] sm:$0xff] }
 0x11b   :  { %1336 = vmatpush3.bf16.msra.mxu0 %v1333_v14  ;;  %v1319_v3 = vpack.c.bf16 %v530_v0, %v529_v63  ;;  %1318 = vmatprep.subr.bf16.mxu1 %v1317_v61  ;;  %v532_v14 = vld [vmem:[%s1991_s3 + $0x58] sm:$0xff]  ;;  %v104_v63 = vld [vmem:[%s1992_s2] sm:$0x3] }
 0x11c   :  { %1338 = vmatprep.subr.bf16.mxu0 %v1337_v27  ;;  %v1323_v17 = vpack.c.bf16 %v532_v14, %v531_v12 }
 0x11d   :  { %1320 = vmatpush3.bf16.msra.mxu1 %v1319_v3 }
 0x11e   :  { %1322 = vmatprep.subr.bf16.mxu1 %v1321_v10 }
 0x11f   :  { %1340 = vmatpush3.bf16.msra.mxu0 %v1337_v27  ;;  %v534_v27 = vld [vmem:[%s1991_s3 + $0x68] sm:$0xff] }
 0x120   :  { %1342 = vmatprep.subr.bf16.mxu0 %v1341_v40  ;;  %v1327_v29 = vpack.c.bf16 %v534_v27, %v533_v25 }
 0x121   :  { %1324 = vmatpush3.bf16.msra.mxu1 %v1323_v17 }
 0x122   :  { %1326 = vmatprep.subr.bf16.mxu1 %v1325_v23 }
 0x123   :  { %1344 = vmatpush3.bf16.msra.mxu0 %v1341_v40  ;;  %v536_v40 = vld [vmem:[%s1991_s3 + $0x78] sm:$0xff] }
 0x124   :  { %1346 = vmatprep.subr.bf16.mxu0 %v1345_v57  ;;  %v1331_v45 = vpack.c.bf16 %v536_v40, %v535_v36 }
 0x125   :  { %1328 = vmatpush3.bf16.msra.mxu1 %v1327_v29 }
 0x126   :  { %1330 = vmatprep.subr.bf16.mxu1 %v1329_v38 }
 0x127   :  { %1348 = vmatpush3.bf16.msra.mxu0 %v1345_v57 }
 0x128   :  { %1350 = vmatprep.subr.bf16.mxu0 %v1349_v7 }
 0x129   :  { %1332 = vmatpush3.bf16.msra.mxu1 %v1331_v45 }
 0x12a   :  { %1365 = vmatprep.subr.bf16.mxu1 %v1396_v44 }
 0x12b   :  { %1352 = vmatpush3.bf16.msra.mxu0 %v1349_v7 }
 0x12c   :  { %1354 = vmatprep.subr.bf16.mxu0 %v1353_v20 }
 0x12f   :  { %1356 = vmatpush3.bf16.msra.mxu0 %v1353_v20 }
 0x130   :  { %1358 = vmatprep.subr.bf16.mxu0 %v1357_v32 }
 0x133   :  { %1360 = vmatpush3.bf16.msra.mxu0 %v1357_v32 }
 0x134   :  { %1362 = vmatprep.subr.bf16.mxu0 %v1361_v46 }
 0x137   :  { %1364 = vmatpush3.bf16.msra.mxu0 %v1361_v46 }
 0x1ed   :  { %v455_v48 = vpop.f32.mrb[8].mxu0 }
 0x1ee   :  { %v459_v50 = vmul.f32 0.001953125, %v455_v48  ;;  %v1139_v53 = vpop.f32.mrb[9].mxu0 }
 0x1f0   :  { %v460_v54 = vmul.f32 %v459_v50, %v459_v50 }
 0x1f2   :  { %v462_v57 = vrot.slane %v460_v54, 7 }
 0x1f4   :  { %v464_v58 = vsub.f32 %v459_v50, %v462_v57 }
 0x1f6   :  { %v465_v60 = vadd.f32 1e-05, %v464_v58 }
 0x1f8   :  { %1392 = vrsqrt.f32 %v465_v60 }
 0x202   :  { %v1393_v61 = vpop.eup %1392 }
 0x203   :  { %v468_v0 = vrot.slane %v1393_v61, 1 }
 0x205   :  { %v470_v3 = vmul.f32 %v468_v0, %v104_v63 }
 0x207   :  { %v471_v6 = vmul.f32 %v470_v3, %v459_v50  ;;  %v479_v7 = vrot.slane %v470_v3, %v478_v2 }
 0x209   :  { %v473_v8 = vrot.slane %v471_v6, 7  ;;  %v482_v12 = vmul.f32 %v479_v7, %v1750_v24  ;;  %v483_v14 = vmul.f32 %v479_v7, %v1759_v35  ;;  %v480_v17 = vmul.f32 %v479_v7, %v1744_v11 }
 0x20a   :  { %v481_v18 = vmul.f32 %v479_v7, %v1746_v19 }
 0x20b   :  { %v475_v10 = vsub.f32 %v104_v63, %v473_v8 }
 0x20d   :  { %v487_v15 = vrot.slane %v475_v10, %v486_v9 }
 0x20f   :  { %v491_v20 = vadd.f32 %v487_v15, %v483_v14  ;;  %v488_v21 = vadd.f32 %v487_v15, %v480_v17  ;;  %v489_v22 = vadd.f32 %v487_v15, %v481_v18  ;;  %v490_v23 = vadd.f32 %v487_v15, %v482_v12 }
 0x211   :  { %v492_v25 = vmax.f32 %v488_v21, 0.0  ;;  %v495_v27 = vmax.f32 %v491_v20, 0.0  ;;  %v493_v28 = vmax.f32 %v489_v22, 0.0  ;;  %v494_v29 = vmax.f32 %v490_v23, 0.0 }
 0x213   :  { %v497_v31 = vrot.slane %v492_v25, 7  ;;  %633 = vmatprep.mubr.f32.mxu1 %v492_v25  ;;  %v500_v24 = vrot.slane %v495_v27, 7  ;;  %v509_v32 = vrot.slane %v492_v25, 1  ;;  %v510_v35 = vrot.slane %v493_v28, 1 }
 0x214   :  { %v511_v33 = vrot.slane %v494_v29, 1  ;;  %v512_v34 = vrot.slane %v495_v27, 1  ;;  %v498_v36 = vrot.slane %v493_v28, 7  ;;  %v499_v42 = vrot.slane %v494_v29, 7 }
 0x215   :  { %v504_v11 = vsel %vm109_vm1, %v500_v24, %v497_v31  ;;  %v515_v19 = vsel %vm130_vm0, %v509_v32, %v510_v35 }
 0x216   :  { %894 = vmatmul.mubr.msk.f32.vlgmr.msra.gmra.mrb[4].mxu1 %vm1618_vm2, %v504_v11  ;;  %1172 = vmatprep.mubr.f32.mxu0 %v515_v19  ;;  %v514_v38 = vsel %vm130_vm0, %v510_v35, %v511_v33  ;;  %v513_v40 = vsel %vm130_vm0, %v511_v33, %v512_v34  ;;  %v503_v41 = vsel %vm109_vm1, %v497_v31, %v498_v36 }
 0x217   :  { %638 = vmatprep.mubr.f32.mxu1 %v493_v28  ;;  %1173 = vmatmul.mubr.msk.f32.vlgmr.msra.gmra.mrb[10].mxu0 %vm1626_vm3, %v514_v38  ;;  %v516_v26 = vsel %vm130_vm0, %v512_v34, %v509_v32  ;;  %v502_v30 = vsel %vm109_vm1, %v498_v36, %v499_v42 }
 0x218   :  { %1175 = vmatprep.mubr.f32.mxu0 %v513_v40  ;;  %1367 = vmatpush3.bf16.msra.mxu1 %v1668_v43  ;;  %v501_v43 = vsel %vm109_vm1, %v499_v42, %v500_v24  ;;  %v496_v40 = vld [vmem:[%s1993_s4] sm:$0x3] }
 0x219   :  { %1368 = vmatprep.subr.bf16.mxu1 %v1396_v44 }
 0x21a   :  { %639 = vmatmul.mubr.f32.gmra.mrb[6].mxu1 %v503_v41 }
 0x21b   :  { %643 = vmatprep.mubr.f32.mxu1 %v494_v29  ;;  %1176 = vmatmul.mubr.msk.f32.gmra.mrb[12].mxu0 %vm1644_vm4, %v516_v26 }
 0x21c   :  { %1370 = vmatpush3.bf16.msra.mxu1 %v1679_v47 }
 0x21d   :  { %1371 = vmatprep.subr.bf16.mxu1 %v1396_v44 }
 0x21e   :  { %896 = vmatmul.mubr.msk.f32.gmra.mrb[8].mxu1 %vm1651_vm5, %v502_v30 }
 0x21f   :  { %648 = vmatprep.mubr.f32.mxu1 %v495_v27 }
 0x220   :  { %1373 = vmatpush3.bf16.msra.mxu1 %v1689_v52 }
 0x221   :  { %1374 = vmatprep.subr.bf16.mxu1 %v1396_v44 }
 0x222   :  { %649 = vmatmul.mubr.f32.gmra.mrb[10].mxu1 %v501_v43 }
 0x223   :  { %1210 = vmatprep.mubr.msk.f32.mxu1 %vm1397_vm6, %v1398_v4 }
 0x224   :  { %1376 = vmatpush3.bf16.msra.mxu1 %v1699_v56 }
 0x225   :  { %1377 = vmatprep.subr.bf16.mxu1 %v1396_v44 }
 0x228   :  { %1379 = vmatpush3.bf16.msra.mxu1 %v1709_v59 }
 0x229   :  { %1380 = vmatprep.subr.bf16.mxu1 %v1396_v44 }
 0x22c   :  { %1382 = vmatpush3.bf16.msra.mxu1 %v1719_v62 }
 0x22d   :  { %1383 = vmatprep.subr.bf16.mxu1 %v1396_v44 }
 0x230   :  { %1385 = vmatpush3.bf16.msra.mxu1 %v1729_v1 }
 0x231   :  { %1386 = vmatprep.subr.bf16.mxu1 %v1396_v44 }
 0x234   :  { %1388 = vmatpush3.bf16.msra.mxu1 %v1740_v5 }
 0x2e9   :  { %v1018_v37 = vpop.f32.mrb[4].mxu1 }
 0x2ea   :  { %v1019_v39 = vpop.f32.mrb[5].mxu1  ;;  %v1174_v47 = vpop.f32.mrb[10].mxu0 }
 0x2eb   :  { %v1020_v52 = vadd.f32 %v1019_v39, %v1018_v37  ;;  %v720_v56 = vpop.f32.mrb[11].mxu0 }
 0x2ed   :  { %v721_v4 = vadd.f32 %v1020_v52, %v720_v56  ;;  %v1021_v45 = vpop.f32.mrb[6].mxu1 }
 0x2ee   :  { %v1022_v59 = vpop.f32.mrb[7].mxu1  ;;  %v1177_v46 = vpop.f32.mrb[12].mxu0 }
 0x2ef   :  { %v1023_v48 = vadd.f32 %v1022_v59, %v1021_v45  ;;  %v730_v50 = vpop.f32.mrb[13].mxu0  ;;  %v748_v5 = vmul.f32 %v721_v4, %v721_v4 }
 0x2f1   :  { %v726_v62 = vadd.f32 %v1174_v47, %v1023_v48  ;;  %v1024_v53 = vpop.f32.mrb[8].mxu1 }
 0x2f2   :  { %v1025_v54 = vpop.f32.mrb[9].mxu1 }
 0x2f3   :  { %v1026_v57 = vadd.f32 %v1025_v54, %v1024_v53  ;;  %v749_v1 = vmul.f32 %v726_v62, %v726_v62  ;;  %v739_v61 = vadd.f32 %v726_v62, %v721_v4 }
 0x2f5   :  { %v731_v58 = vadd.f32 %v1026_v57, %v730_v50  ;;  %v1027_v44 = vpop.f32.mrb[10].mxu1  ;;  %v752_v3 = vadd.f32 %v749_v1, %v748_v5 }
 0x2f6   :  { %v1028_v60 = vpop.f32.mrb[11].mxu1 }
 0x2f7   :  { %v750_v63 = vmul.f32 %v731_v58, %v731_v58  ;;  %v1029_v0 = vadd.f32 %v1028_v60, %v1027_v44  ;;  %v740_v6 = vadd.f32 %v739_v61, %v731_v58 }
 0x2f9   :  { %v736_v7 = vadd.f32 %v1177_v46, %v1029_v0  ;;  %v753_v8 = vadd.f32 %v752_v3, %v750_v63 }
 0x2fb   :  { %v741_v10 = vadd.f32 %v740_v6, %v736_v7  ;;  %v751_v12 = vmul.f32 %v736_v7, %v736_v7 }
 0x2fd   :  { %v742_v14 = vrot.slane %v741_v10, 4  ;;  %v754_v15 = vadd.f32 %v753_v8, %v751_v12 }
 0x2ff   :  { %v743_v17 = vadd.f32 %v742_v14, %v741_v10  ;;  %v755_v18 = vrot.slane %v754_v15, 4 }
 0x301   :  { %v744_v20 = vrot.slane %v743_v17, 2  ;;  %v756_v21 = vadd.f32 %v755_v18, %v754_v15 }
 0x303   :  { %v745_v22 = vadd.f32 %v744_v20, %v743_v17  ;;  %v757_v23 = vrot.slane %v756_v21, 2 }
 0x305   :  { %v746_v25 = vrot.slane %v745_v22, 1  ;;  %v758_v27 = vadd.f32 %v757_v23, %v756_v21 }
 0x307   :  { %v759_v28 = vrot.slane %v758_v27, 1  ;;  %v747_v29 = vadd.f32 %v746_v25, %v745_v22 }
 0x309   :  { %v760_v31 = vadd.f32 %v759_v28, %v758_v27 }
 0x30b   :  { %v761_v24 = vsel %vm387_vm7, %v747_v29, %v760_v31 }
 0x30c   :  { %1211 = vmatmul.mubr.f32.vlgmr.msra.gmra.mrb[12].mxu1 %v761_v24 }
 0x3df   :  { %v828_v32 = vpop.f32.mrb[12].mxu1 }
 0x3e0   :  { %v832_v35 = vmul.f32 0.001953125, %v828_v32  ;;  %v1212_v33 = vpop.f32.mrb[13].mxu1 }
 0x3e2   :  { %v833_v34 = vmul.f32 %v832_v35, %v832_v35 }
 0x3e4   :  { %v835_v11 = vrot.slane %v833_v34, 7 }
 0x3e6   :  { %v837_v19 = vsub.f32 %v832_v35, %v835_v11 }
 0x3e8   :  { %v838_v36 = vadd.f32 1e-05, %v837_v19 }
 0x3ea   :  { %1394 = vrsqrt.f32 %v838_v36 }
 0x3f4   :  { %v1395_v38 = vpop.eup %1394 }
 0x3f5   :  { %v841_v41 = vrot.slane %v1395_v38, 1 }
 0x3f7   :  { %v843_v42 = vmul.f32 %v841_v41, %v496_v40 }
 0x3f9   :  { %v844_v26 = vmul.f32 %v843_v42, %v832_v35  ;;  %v852_v30 = vrot.slane %v843_v42, %v478_v2 }
 0x3fb   :  { %v846_v43 = vrot.slane %v844_v26, 7  ;;  %v853_v39 = vmul.f32 %v852_v30, %v721_v4  ;;  %v854_v47 = vmul.f32 %v852_v30, %v726_v62  ;;  %v855_v52 = vmul.f32 %v852_v30, %v731_v58 }
 0x3fc   :  { %v856_v56 = vmul.f32 %v852_v30, %v736_v7 }
 0x3fd   :  { %v848_v37 = vsub.f32 %v496_v40, %v846_v43 }
 0x3ff   :  { %v860_v45 = vrot.slane %v848_v37, %v486_v9 }
 0x401   :  { %v861_v59 = vadd.f32 %v860_v45, %v853_v39  ;;  %v862_v46 = vadd.f32 %v860_v45, %v854_v47  ;;  %v863_v48 = vadd.f32 %v860_v45, %v855_v52  ;;  %v864_v50 = vadd.f32 %v860_v45, %v856_v56 }
 0x403   :  { %v865_v53 = vmax.f32 %v861_v59, 0.0  ;;  %v866_v54 = vmax.f32 %v862_v46, 0.0  ;;  %v867_v57 = vmax.f32 %v863_v48, 0.0  ;;  %v868_v1 = vmax.f32 %v864_v50, 0.0 }
 0x405   :  { %v869_v44 = vadd.f32 %v865_v53, %v1541_v51  ;;  %v870_v2 = vadd.f32 %v866_v54, %v1552_v55  ;;  %v871_v4 = vadd.f32 %v867_v57, %v1607_v16  ;;  %v872_v62 = vadd.f32 %v868_v1, %v1601_v13 }
 0x407   :  { %v873_v58 = vmax.f32 %v869_v44, 0.0  ;;  %v874_v60 = vmax.f32 %v870_v2, 0.0  ;;  %v875_v49 = vmax.f32 %v871_v4, 0.0  ;;  %v876_v9 = vmax.f32 %v872_v62, 0.0 }
 0x409   :  { %877 = vst [vmem:[%s1994_s6] sm:$0xff] %v873_v58  ;;  %878 = vst [vmem:[%s1994_s6 + $0x8] sm:$0xff] %v874_v60 }
 0x40a   :  { %879 = vst [vmem:[%s1994_s6 + $0x10] sm:$0xff] %v875_v49  ;;  %880 = vst [vmem:[%s1994_s6 + $0x18] sm:$0xff] %v876_v9 }

</bundles_post_ra>
